<compile_context>
chip_gen: v6e
topology: v6e:2x2x1
jax: 0.10.0
libtpu: 0.0.40
codegen_flags: <defaults>
</compile_context>

<pallas_src>
import math
import functools

import jax
import jax.numpy as jnp
from jax.experimental import pallas as pl
from jax.experimental.pallas import tpu as pltpu

_MiB = 1024 * 1024


def _round_up(v, m):
    return (v + m - 1) // m * m


# ---------------------------------------------------------------------------
# Hardware query (trace-time, with safe fallbacks)
# ---------------------------------------------------------------------------
def _tpu_generation_params():
    """Returns (physical_vmem_bytes, num_tensorcores_per_chip)."""
    vmem_bytes = 64 * _MiB          # conservative default (v7x per-TC VMEM)
    num_tc = 1
    try:
        info = pltpu.get_tpu_info()
        vmem_bytes = int(getattr(info, "vmem_capacity_bytes", vmem_bytes))
        for attr in ("num_cores", "tensorcore_count", "num_tensorcores"):
            if hasattr(info, attr):
                num_tc = max(1, int(getattr(info, attr)))
                break
    except Exception:
        pass
    if num_tc == 1:
        try:
            kind = jax.devices()[0].device_kind.lower()
            if ("v7" in kind) or ("v4" in kind) or ("v5p" in kind):
                num_tc = 2
        except Exception:
            pass
    return vmem_bytes, num_tc


# ---------------------------------------------------------------------------
# Kernels (operands cast to the MXU compute dtype on the tile, in-kernel)
# ---------------------------------------------------------------------------
def _cast(v, compute_dtype):
    if compute_dtype is not None and v.dtype != jnp.dtype(compute_dtype):
        return v.astype(compute_dtype)
    return v


def _fc_single_pass_kernel(x_ref, w_ref, b_ref, o_ref, *, apply_relu, compute_dtype):
    """grid = (M//tm, N//tn); full K resident in VMEM -> no accumulator."""
    a = _cast(x_ref[...], compute_dtype)
    wt = _cast(w_ref[...], compute_dtype)
    acc = jnp.dot(a, wt, preferred_element_type=jnp.float32)
    out = acc + b_ref[...].astype(jnp.float32)
    if apply_relu:
        out = jnp.maximum(out, 0.0)
    o_ref[...] = out.astype(o_ref.dtype)


def _fc_ktiled_inplace_kernel(x_ref, w_ref, b_ref, o_ref, *, apply_relu, compute_dtype):
    """grid = (M//tm, N//tn, K//tk); f32 output -> accumulate into o_ref directly
    (output block is resident across the 'arbitrary' K axis)."""
    k = pl.program_id(2)

    @pl.when(k == 0)
    def _():
        o_ref[...] = jnp.zeros_like(o_ref)

    a = _cast(x_ref[...], compute_dtype)
    wt = _cast(w_ref[...], compute_dtype)
    o_ref[...] += jnp.dot(a, wt, preferred_element_type=jnp.float32)

    @pl.when(k == pl.num_programs(2) - 1)
    def _():
        out = o_ref[...] + b_ref[...].astype(jnp.float32)
        if apply_relu:
            out = jnp.maximum(out, 0.0)
        o_ref[...] = out


def _fc_ktiled_scratch_kernel(x_ref, w_ref, b_ref, o_ref, acc_ref, *, apply_relu,
                              compute_dtype):
    """K-tiled path for narrow output dtypes: f32 accumulator scratch."""
    k = pl.program_id(2)

    @pl.when(k == 0)
    def _():
        acc_ref[...] = jnp.zeros_like(acc_ref)

    a = _cast(x_ref[...], compute_dtype)
    wt = _cast(w_ref[...], compute_dtype)
    acc_ref[...] += jnp.dot(a, wt, preferred_element_type=jnp.float32)

    @pl.when(k == pl.num_programs(2) - 1)
    def _():
        out = acc_ref[...] + b_ref[...].astype(jnp.float32)
        if apply_relu:
            out = jnp.maximum(out, 0.0)
        o_ref[...] = out.astype(o_ref.dtype)


# ---------------------------------------------------------------------------
# Tiling / VMEM helpers
# ---------------------------------------------------------------------------
def _pick_tile(extent, cap, quantum, minimize_blocks_first=False):
    """Pick a tile size (multiple of `quantum`, <= cap) for an aligned extent.

    minimize_blocks_first=True  -> fewest blocks, then least padding (M axis:
                                   fewer blocks = fewer W re-reads).
    minimize_blocks_first=False -> least padding, then fewest blocks (N/K axes:
                                   padding directly inflates weight streaming).
    """
    cap = max(quantum, min(cap, extent))
    cands = range(quantum, cap + 1, quantum)

    def key(c):
        blocks = -(-extent // c)
        pad = blocks * c - extent
        return (blocks, pad, -c) if minimize_blocks_first else (pad, blocks, -c)

    return min(cands, key=key)


def _pipeline_bytes(tm, tn, tk, x_bytes, w_bytes, b_bytes, out_bytes, cast_bytes,
                    scratch=False):
    # double-buffered inputs + bias + output (+ in-kernel cast temporaries)
    buf = (2 * (tm * tk * x_bytes + tk * tn * w_bytes)
           + 2 * tn * b_bytes + 2 * tm * tn * out_bytes)
    if cast_bytes:
        buf += (tm * tk + tk * tn) * cast_bytes
    if scratch:
        buf += tm * tn * 4
    return buf


def _maybe_pad2d(a, rows, cols):
    r, c = a.shape
    if (r, c) == (rows, cols):
        return a                       # no copy when already aligned
    return jnp.pad(a, ((0, rows - r), (0, cols - c)))


# ---------------------------------------------------------------------------
# Public wrapper
# ---------------------------------------------------------------------------
def fc_forward(x, w, b, activation="relu", *, compute_dtype=jnp.bfloat16,
               tm=None, tn=None, tk=None):
    """Pallas FC layer: (x @ w + b), optionally ReLU'd.

    x: [M, K], w: [K, N], b: [N].
    compute_dtype: dtype of the MXU operands (cast per-tile inside the kernel,
    f32 accumulation either way).  Default bf16 — an explicit, documented
    deviation from the f32 PyTorch reference (use compute_dtype=None for f32).
    """
    M, K = x.shape
    K2, N = w.shape
    assert K == K2 and b.shape == (N,)

    out_dtype = x.dtype
    x_bytes = jnp.dtype(x.dtype).itemsize
    w_bytes = jnp.dtype(w.dtype).itemsize
    b_bytes = jnp.dtype(b.dtype).itemsize
    out_bytes = jnp.dtype(out_dtype).itemsize
    cast_bytes = jnp.dtype(compute_dtype).itemsize if compute_dtype is not None else 0
    apply_relu = activation == "relu"

    # ---- generation-aware VMEM budgets ------------------------------------
    vmem_phys, num_tc = _tpu_generation_params()
    if vmem_phys >= 100 * _MiB:            # v5e / v6e (128 MiB physical)
        vmem_budget = 48 * _MiB
        vmem_cap = 96 * _MiB
    else:                                  # v7x (64 MiB per TC)
        vmem_budget = 24 * _MiB
        vmem_cap = 40 * _MiB

    # ---- hardware-aligned extents ------------------------------------------
    m_al = _round_up(M, 8)
    n_al = _round_up(N, 128)
    k_al = _round_up(K, 128)

    # ---- tile selection ------------------------------------------------------
    if tm is None:
        tm = m_al if m_al <= 512 else _pick_tile(m_al, 512, 8,
                                                 minimize_blocks_first=True)
    else:
        tm = min(_round_up(tm, 8), m_al)

    if tn is None:
        tn = _pick_tile(n_al, 512, 128)
        # Split N into >=2 blocks only on 2-TensorCore chips (megacore / v7x)
        # and only when the grid would otherwise be a single block.
        if (num_tc >= 2 and n_al >= 256
                and (-(-m_al // tm)) == 1 and (-(-n_al // tn)) == 1):
            tn = _pick_tile(n_al, n_al // 2, 128)
    else:
        tn = min(_round_up(tn, 128), n_al)

    def bytes_single(kp):
        return _pipeline_bytes(tm, tn, kp, x_bytes, w_bytes, b_bytes, out_bytes,
                               cast_bytes)

    if tk is None:
        if bytes_single(k_al) <= vmem_budget:
            tk = k_al                                    # single-pass (full K)
        else:
            cands = [c for c in range(128, min(2048, k_al) + 1, 128)
                     if _pipeline_bytes(tm, tn, c, x_bytes, w_bytes, b_bytes,
                                        out_bytes, cast_bytes, scratch=True)
                     <= vmem_budget]
            if not cands:
                cands = [128]
            tk = min(cands, key=lambda c: ((-(-k_al // c)) * c - k_al,
                                           -(-k_al // c), -c))
    else:
        tk = min(_round_up(tk, 128), k_al)

    single_pass = tk >= k_al

    # padded problem extents (zero padding along K is exact for the matmul)
    Mp = _round_up(m_al, tm)
    Np = _round_up(n_al, tn)
    Kp = k_al if single_pass else _round_up(k_al, tk)
    if single_pass:
        tk = Kp

    # pad only when actually needed (no wrapper-side dtype casts / full copies)
    xp = _maybe_pad2d(x, Mp, Kp)
    wp = _maybe_pad2d(w, Kp, Np)
    bp = _maybe_pad2d(b.reshape(1, N), 1, Np)

    gi, gj = Mp // tm, Np // tn

    if single_pass:
        grid = (gi, gj)
        grid_spec = pltpu.PrefetchScalarGridSpec(
            num_scalar_prefetch=0,
            grid=grid,
            in_specs=[
                pl.BlockSpec((tm, Kp), lambda i, j: (i, 0)),   # x tile (full K)
                pl.BlockSpec((Kp, tn), lambda i, j: (0, j)),   # w tile (full K)
                pl.BlockSpec((1, tn), lambda i, j: (0, j)),    # bias tile
            ],
            out_specs=pl.BlockSpec((tm, tn), lambda i, j: (i, j)),
        )
        kernel = functools.partial(_fc_single_pass_kernel,
                                   apply_relu=apply_relu,
                                   compute_dtype=compute_dtype)
        dim_sem = ("parallel", "parallel")
        needed = bytes_single(Kp)
    else:
        grid = (gi, gj, Kp // tk)
        use_scratch = jnp.dtype(out_dtype) != jnp.dtype(jnp.float32)
        in_specs = [
            pl.BlockSpec((tm, tk), lambda i, j, k: (i, k)),    # x tile
            pl.BlockSpec((tk, tn), lambda i, j, k: (k, j)),    # w tile
            pl.BlockSpec((1, tn), lambda i, j, k: (0, j)),     # bias tile
        ]
        out_spec = pl.BlockSpec((tm, tn), lambda i, j, k: (i, j))
        if use_scratch:
            grid_spec = pltpu.PrefetchScalarGridSpec(
                num_scalar_prefetch=0, grid=grid, in_specs=in_specs,
                out_specs=out_spec,
                scratch_shapes=[pltpu.VMEM((tm, tn), jnp.float32)])
            kernel = functools.partial(_fc_ktiled_scratch_kernel,
                                       apply_relu=apply_relu,
                                       compute_dtype=compute_dtype)
        else:
            # f32 output: accumulate directly into the resident output block
            grid_spec = pltpu.PrefetchScalarGridSpec(
                num_scalar_prefetch=0, grid=grid, in_specs=in_specs,
                out_specs=out_spec)
            kernel = functools.partial(_fc_ktiled_inplace_kernel,
                                       apply_relu=apply_relu,
                                       compute_dtype=compute_dtype)
        dim_sem = ("parallel", "parallel", "arbitrary")
        needed = _pipeline_bytes(tm, tn, tk, x_bytes, w_bytes, b_bytes,
                                 out_bytes, cast_bytes, scratch=use_scratch)
        # TODO(synk): on v7x consider pipeline_mode=pl.Buffered(3) on the w spec
        # if profiling shows exposed weight DMA.

    # vmem limit: generation-aware cap, but never clamp below what the chosen
    # (possibly caller-supplied) tiles actually need.
    desired = needed + 4 * _MiB
    vmem_limit = min(max(desired, 16 * _MiB), vmem_cap)
    if desired > vmem_limit:
        vmem_limit = min(desired, max(vmem_phys - 8 * _MiB, vmem_cap))
    vmem_limit = int(vmem_limit)

    cost = pl.CostEstimate(
        flops=2 * Mp * Np * Kp,
        transcendentals=0,
        bytes_accessed=int(x_bytes * Mp * Kp * gj      # x re-read per N block
                           + w_bytes * Kp * Np * gi    # w re-read per M block
                           + b_bytes * Np * gi
                           + out_bytes * Mp * Np),
    )

    out_p = pl.pallas_call(
        kernel,
        out_shape=jax.ShapeDtypeStruct((Mp, Np), out_dtype),
        grid_spec=grid_spec,
        compiler_params=pltpu.CompilerParams(
            dimension_semantics=dim_sem,
            vmem_limit_bytes=vmem_limit,
        ),
        cost_estimate=cost,
    )(xp, wp, bp)

    if (Mp, Np) != (M, N):
        out_p = out_p[:M, :N]
    return out_p


def init_fc_params(key, indim, outdim):
    """Deterministic init matching the PyTorch module's __init__:
    - w: kaiming_uniform_(a=sqrt(5)) on a (indim, outdim) tensor
         (torch fan_in = tensor.size(1) = outdim  ->  bound = 1/sqrt(outdim))
    - b: uniform_(-0.1, 0.1)
    """
    kw, kb = jax.random.split(key)
    gain = math.sqrt(2.0 / (1.0 + 5.0))            # a = sqrt(5)
    bound_w = gain * math.sqrt(3.0 / outdim)       # = 1/sqrt(outdim)
    w = jax.random.uniform(
        kw, (indim, outdim), jnp.float32, minval=-bound_w, maxval=bound_w
    )
    b = jax.random.uniform(kb, (outdim,), jnp.float32, minval=-0.1, maxval=0.1)
    return w, b


if __name__ == "__main__":
    key = jax.random.PRNGKey(0)
    kx, kp, kx2 = jax.random.split(key, 3)

    # Small shapes consistent with the module's forward (x: [batch, indim])
    batch, indim, outdim = 8, 256, 128
    x = jax.random.normal(kx, (batch, indim), jnp.float32)
    w, b = init_fc_params(kp, indim, outdim)
    ref_relu = jnp.maximum(x @ w + b, 0.0)
    ref_lin = x @ w + b

    # 1) default path: bf16 MXU operands (cast in-kernel, no wrapper copies),
    #    f32 accumulate, single-pass kernel
    out = jax.block_until_ready(fc_forward(x, w, b, activation="relu"))
    assert out.shape == (batch, outdim)
    assert jnp.allclose(out, ref_relu, atol=2e-2, rtol=2e-2), "relu path mismatch"

    # 2) no-activation, forced K-tiled path (f32 output accumulates in o_ref)
    out2 = jax.block_until_ready(fc_forward(x, w, b, activation=None, tk=128))
    assert jnp.allclose(out2, ref_lin, atol=2e-2, rtol=2e-2), "linear path mismatch"

    # 3) full-f32 single-pass path
    out3 = jax.block_until_ready(
        fc_forward(x, w, b, activation="relu", compute_dtype=None)
    )
    assert jnp.allclose(out3, ref_relu, atol=1e-3, rtol=1e-3), "f32 path mismatch"

    # 4) unaligned shapes exercise the minimal-padding + output-slice path
    m2, k2, n2 = 5, 200, 70
    xu = jax.random.normal(kx2, (m2, k2), jnp.float32)
    wu, bu = init_fc_params(jax.random.PRNGKey(1), k2, n2)
    outu = jax.block_until_ready(fc_forward(xu, wu, bu, activation="relu"))
    refu = jnp.maximum(xu @ wu + bu, 0.0)
    assert outu.shape == (m2, n2)
    assert jnp.allclose(outu, refu, atol=2e-2, rtol=2e-2), "padded path mismatch"

    # 5) bf16 output dtype exercises the scratch-accumulator K-tiled kernel
    xb = x.astype(jnp.bfloat16)
    outb = jax.block_until_ready(fc_forward(xb, w, b, activation="relu", tk=128))
    assert outb.dtype == jnp.bfloat16
    assert jnp.allclose(outb.astype(jnp.float32), ref_relu, atol=5e-2, rtol=5e-2), \
        "bf16-output path mismatch"

    print("KERNEL_OK")
</pallas_src>

<mosaic_0001>
module attributes {stable_mosaic.version = 11 : i64} {
  func.func @_fc_single_pass_kernel(%arg0: i32, %arg1: i32, %arg2: memref<8x256xf32, #tpu.memory_space<vmem>>, %arg3: memref<256x128xf32, #tpu.memory_space<vmem>>, %arg4: memref<1x128xf32, #tpu.memory_space<vmem>>, %arg5: memref<8x128xf32, #tpu.memory_space<vmem>>) attributes {dimension_semantics = [#tpu.dimension_semantics<parallel>, #tpu.dimension_semantics<parallel>], iteration_bounds = array<i64: 1, 1>, scalar_prefetch = 0 : i64, scratch_operands = 0 : i64, tpu.core_type = #tpu.core_type<tc>, window_params = [{transform_indices = @transform_0, window_bounds = array<i64: 8, 256>}, {transform_indices = @transform_1, window_bounds = array<i64: 256, 128>}, {transform_indices = @transform_2, window_bounds = array<i64: 1, 128>}, {transform_indices = @transform_3, window_bounds = array<i64: 8, 128>}]} {
    %c0 = arith.constant 0 : index
    %c0_0 = arith.constant 0 : index
    %0 = vector.load %arg2[%c0, %c0_0] : memref<8x256xf32, #tpu.memory_space<vmem>>, vector<8x256xf32>
    %1 = arith.truncf %0 : vector<8x256xf32> to vector<8x256xbf16>
    %c0_1 = arith.constant 0 : index
    %c0_2 = arith.constant 0 : index
    %2 = vector.load %arg3[%c0_1, %c0_2] : memref<256x128xf32, #tpu.memory_space<vmem>>, vector<256x128xf32>
    %3 = arith.truncf %2 : vector<256x128xf32> to vector<256x128xbf16>
    %cst = arith.constant dense<0.000000e+00> : vector<8x128xf32>
    %4 = tpu.matmul %1, %3, %cst {dimension_numbers = #tpu.dot_dimension_numbers<[1], [0], [0], [1], [0, 0, 1, 1], [], []>} : vector<8x256xbf16>, vector<256x128xbf16>, vector<8x128xf32> -> vector<8x128xf32>
    %c0_3 = arith.constant 0 : index
    %c0_4 = arith.constant 0 : index
    %5 = vector.load %arg4[%c0_3, %c0_4] : memref<1x128xf32, #tpu.memory_space<vmem>>, vector<1x128xf32>
    %6 = vector.broadcast %5 : vector<1x128xf32> to vector<8x128xf32>
    %7 = arith.addf %4, %6 : vector<8x128xf32>
    %cst_5 = arith.constant 0.000000e+00 : f32
    %8 = vector.broadcast %cst_5 : f32 to vector<8x128xf32>
    %9 = arith.maximumf %7, %8 : vector<8x128xf32>
    %c0_6 = arith.constant 0 : index
    %c0_7 = arith.constant 0 : index
    %10 = vector.load %arg5[%c0_6, %c0_7] : memref<8x128xf32, #tpu.memory_space<vmem>>, vector<8x128xf32>
    tpu.vector_store %arg5[%c0_6, %c0_7], %9 {strides = array<i32>} : memref<8x128xf32, #tpu.memory_space<vmem>>, vector<8x128xf32>,
    return
  }
  func.func @transform_0(%arg0: i32, %arg1: i32) -> (i32, i32) {
    %c0_i32 = arith.constant 0 : i32
    %c0_i32_0 = arith.constant 0 : i32
    return %arg0, %c0_i32 : i32, i32
  }
  func.func @transform_1(%arg0: i32, %arg1: i32) -> (i32, i32) {
    %c0_i32 = arith.constant 0 : i32
    %c0_i32_0 = arith.constant 0 : i32
    return %c0_i32, %arg1 : i32, i32
  }
  func.func @transform_2(%arg0: i32, %arg1: i32) -> (i32, i32) {
    %c0_i32 = arith.constant 0 : i32
    %c0_i32_0 = arith.constant 0 : i32
    return %c0_i32, %arg1 : i32, i32
  }
  func.func @transform_3(%arg0: i32, %arg1: i32) -> (i32, i32) {
    %c0_i32 = arith.constant 0 : i32
    return %arg0, %arg1 : i32, i32
  }
}

</mosaic_0001>

<bundles_post_ra>
// kernel: tpu_custom_call.1
= control target key start
LH: loop header
LB: loop body
LE: loop exit
PB: predicated region body
PF: predicated region fallthrough
CT: control target
= control target key end

     0   :  { %8 = vsyncpa [#allocation3], 0  ;;  %s290_s0 = inlined_call_operand.hbm [shape: f32[8,256], index: 0, kind: input, shape index: {}]   ;;  %s291_s1 = inlined_call_operand.hbm [shape: f32[256,128], index: 1, kind: input, shape index: {}]   ;;  %s292_s2 = inlined_call_operand.vmem [shape: f32[1,128], index: 2, kind: input, shape index: {}]   ;;  %s293_s3 = inlined_call_operand.hbm [shape: f32[8,128], index: 3, kind: output, shape index: {}]  }
   0x1   :  { %9 = vsyncpa [#allocation6], 0 }
   0x2   :  { %10 = vsyncpa [#allocation4], 0  ;;  %s253_s12 = smov [#allocation2]   ;;  %s254_s14 = smov [#allocation5]  }
   0x3   :  { %s17_s13 = sshll.u32 %s253_s12, 4  ;;  %s26_s15 = sshll.u32 %s254_s14, 4  ;;  %s18_s13 = int_to_ptr.vmem [resolvable:$true] %s17_s13  ;;  %s27_s15 = int_to_ptr.vmem [resolvable:$true] %s26_s15 }
   0x4   :  { %s195_s16 = scalar_lea.vmem %s18_s13, 256  ;;  %p200_p1 = scmp.lt.s32.totalorder %s18_s13, %s18_s13 }
   0x5   :  { %p196_p0 = scmp.ne.s32.totalorder %s18_s13, %s195_s16  ;;  %p201_p2 = scmp.lt.s32.totalorder %s195_s16, %s195_s16 }
   0x7   :  { %p202_p3 = por %p201_p2, %p200_p1 }
   0x9   :  { %p203_p4 = pnand %p202_p3, %p196_p0 }
   0xb   :  { %206 = shalt.err (!%p203_p4)
}
   0xc   :  { %20 = dma.hbm_to_vmem [thread:$0]  %s290_s0, 256, %s18_s13, [#allocation3]  }
   0xd   :  { %s215_s19 = scalar_lea.vmem %s27_s15, 4096  ;;  %p220_p6 = scmp.lt.s32.totalorder %s27_s15, %s27_s15 }
   0xe   :  { %p216_p5 = scmp.ne.s32.totalorder %s27_s15, %s215_s19  ;;  %p221_p7 = scmp.lt.s32.totalorder %s215_s19, %s215_s19 }
  0x10   :  { %p222_p8 = por %p221_p7, %p220_p6 }
  0x12   :  { %p223_p9 = pnand %p222_p8, %p216_p5 }
  0x14   :  { %226 = shalt.err (!%p223_p9)
}
  0x15   :  { %s255_s20 = smov 128   ;;  %s256_s21 = smov 8  }
  0x16   :  { %32 = dma.hbm_to_vmem [thread:$0]  %s291_s1, 4096, %s27_s15, [#allocation6], %s255_s20, %s255_s20, %s256_s21  }
  0x17   :  { %247 = dma.done.wait [#allocation3], 256  }
  0x18   :  { %248 = vsyncadd [#allocation3], 4294967040 }
  0x19   :  { %249 = dma.done.wait [#allocation6], 4096  }
  0x1a   :  { %250 = vsyncadd [#allocation6], 4294963200  ;;  %v76_v0 = vld [vmem:[#allocation5 + $0xf0] sm:$0xff]  ;;  %v77_v1 = vld [vmem:[#allocation5 + $0xf8] sm:$0xff]  ;;  %s257_s24 = smov [#allocation7]  }
  0x1b   :  { %v60_v2 = vld [vmem:[#allocation5 + $0x70] sm:$0xff]  ;;  %v93_v3 = vpack.c.bf16 %v77_v1, %v76_v0  ;;  %v61_v4 = vld [vmem:[#allocation5 + $0x78] sm:$0xff]  ;;  %v74_v5 = vld [vmem:[#allocation5 + $0xe0] sm:$0xff]  ;;  %s149_s25 = sshll.u32 %s257_s24, 4  ;;  %s150_s25 = int_to_ptr.vmem [resolvable:$true] %s149_s25 }
  0x1c   :  { %v75_v6 = vld [vmem:[#allocation5 + $0xe8] sm:$0xff]  ;;  %v85_v7 = vpack.c.bf16 %v61_v4, %v60_v2  ;;  %v58_v9 = vld [vmem:[#allocation5 + $0x60] sm:$0xff]  ;;  %v72_v11 = vld [vmem:[#allocation5 + $0xd0] sm:$0xff]  ;;  %s227_s26 = scalar_lea.vmem %s150_s25, 128  ;;  %p232_p11 = scmp.lt.s32.totalorder %s150_s25, %s150_s25 }
  0x1d   :  { %v92_v8 = vpack.c.bf16 %v75_v6, %v74_v5  ;;  %v59_v10 = vld [vmem:[#allocation5 + $0x68] sm:$0xff]  ;;  %160 = vmatprep.subr.bf16.mxu0 %v93_v3  ;;  %v73_v12 = vld [vmem:[#allocation5 + $0xd8] sm:$0xff]  ;;  %v56_v15 = vld [vmem:[#allocation5 + $0x50] sm:$0xff]  ;;  %p228_p10 = scmp.ne.s32.totalorder %s150_s25, %s227_s26  ;;  %p233_p12 = scmp.lt.s32.totalorder %s227_s26, %s227_s26 }
  0x1e   :  { %161 = vmatpush3.bf16.msra.mxu0 %v85_v7  ;;  %v84_v13 = vpack.c.bf16 %v59_v10, %v58_v9  ;;  %v91_v14 = vpack.c.bf16 %v73_v12, %v72_v11  ;;  %v57_v16 = vld [vmem:[#allocation5 + $0x58] sm:$0xff]  ;;  %v70_v17 = vld [vmem:[#allocation5 + $0xc0] sm:$0xff]  ;;  %v71_v18 = vld [vmem:[#allocation5 + $0xc8] sm:$0xff] }
  0x1f   :  { %162 = vmatprep.subr.bf16.mxu0 %v92_v8  ;;  %v83_v19 = vpack.c.bf16 %v57_v16, %v56_v15  ;;  %v90_v20 = vpack.c.bf16 %v71_v18, %v70_v17  ;;  %v54_v21 = vld [vmem:[#allocation5 + $0x40] sm:$0xff]  ;;  %v55_v22 = vld [vmem:[#allocation5 + $0x48] sm:$0xff]  ;;  %v68_v23 = vld [vmem:[#allocation5 + $0xb0] sm:$0xff]  ;;  %p234_p13 = por %p233_p12, %p232_p11 }
  0x20   :  { %v69_v24 = vld [vmem:[#allocation5 + $0xb8] sm:$0xff]  ;;  %v82_v27 = vpack.c.bf16 %v55_v22, %v54_v21  ;;  %v52_v29 = vld [vmem:[#allocation5 + $0x30] sm:$0xff]  ;;  %v66_v31 = vld [vmem:[#allocation5 + $0xa0] sm:$0xff] }
  0x21   :  { %v43_v25 = vld [vmem:[#allocation2 + $0x8] sm:$0xff]  ;;  %v89_v28 = vpack.c.bf16 %v69_v24, %v68_v23  ;;  %v67_v32 = vld [vmem:[#allocation5 + $0xa8] sm:$0xff]  ;;  %v50_v35 = vld [vmem:[#allocation5 + $0x20] sm:$0xff]  ;;  %p235_p0 = pnand %p234_p13, %p228_p10 }
  0x22   :  { %163 = vmatpush3.bf16.msra.mxu0 %v84_v13  ;;  %v45_v26 = vpack.c.bf16 %v43_v25, %v43_v25  ;;  %v53_v30 = vld [vmem:[#allocation5 + $0x38] sm:$0xff]  ;;  %v88_v34 = vpack.c.bf16 %v67_v32, %v66_v31  ;;  %v51_v36 = vld [vmem:[#allocation5 + $0x28] sm:$0xff]  ;;  %v64_v37 = vld [vmem:[#allocation5 + $0x90] sm:$0xff] }
  0x23   :  { %164 = vmatprep.subr.bf16.mxu0 %v91_v14  ;;  %v81_v33 = vpack.c.bf16 %v53_v30, %v52_v29  ;;  %v65_v38 = vld [vmem:[#allocation5 + $0x98] sm:$0xff]  ;;  %v80_v39 = vpack.c.bf16 %v51_v36, %v50_v35  ;;  %v48_v41 = vld [vmem:[#allocation5 + $0x10] sm:$0xff]  ;;  %v62_v43 = vld [vmem:[#allocation5 + $0x80] sm:$0xff] }
  0x24   :  { %133 = vmatprep.mubr.bf16.mxu0 %v45_v26  ;;  %v87_v40 = vpack.c.bf16 %v65_v38, %v64_v37  ;;  %v49_v42 = vld [vmem:[#allocation5 + $0x18] sm:$0xff]  ;;  %v63_v44 = vld [vmem:[#allocation5 + $0x88] sm:$0xff]  ;;  %v46_v47 = vld [vmem:[#allocation5] sm:$0xff] }
  0x25   :  { %v79_v45 = vpack.c.bf16 %v49_v42, %v48_v41  ;;  %v86_v46 = vpack.c.bf16 %v63_v44, %v62_v43  ;;  %v47_v48 = vld [vmem:[#allocation5 + $0x8] sm:$0xff]  ;;  %v42_v50 = vld [vmem:[#allocation2] sm:$0xff] }
  0x26   :  { %165 = vmatpush3.bf16.msra.mxu0 %v83_v19  ;;  %v78_v49 = vpack.c.bf16 %v47_v48, %v46_v47  ;;  %v44_v51 = vpack.c.bf16 %v42_v50, %v42_v50  ;;  %v159_v53 = vld [vmem:[%s292_s2] ss:$0 sm:$0xff] }
  0x27   :  { %166 = vmatprep.subr.bf16.mxu0 %v90_v20 }
  0x2a   :  { %167 = vmatpush3.bf16.msra.mxu0 %v82_v27 }
  0x2b   :  { %168 = vmatprep.subr.bf16.mxu0 %v89_v28 }
  0x2e   :  { %169 = vmatpush3.bf16.msra.mxu0 %v81_v33 }
  0x2f   :  { %170 = vmatprep.subr.bf16.mxu0 %v88_v34 }
  0x32   :  { %171 = vmatpush3.bf16.msra.mxu0 %v80_v39 }
  0x33   :  { %172 = vmatprep.subr.bf16.mxu0 %v87_v40 }
  0x36   :  { %173 = vmatpush3.bf16.msra.mxu0 %v79_v45 }
  0x37   :  { %174 = vmatprep.subr.bf16.mxu0 %v86_v46 }
  0x3a   :  { %175 = vmatpush3.bf16.msra.mxu0 %v78_v49 }
  0x3d   :  { %134 = vmatmul.mubr.bf16.vlgmr.msra.gmra.mxu0 %v44_v51 }
  0xfd   :  { %v176_v52 = vpop.f32.mrf.mxu0 }
  0xff   :  { %v177_v54 = vpop.f32.mrf.mxu0 }
 0x100   :  { %v178_v55 = vadd.f32 %v177_v54, %v176_v52 }
 0x101   :  { %v179_v56 = vpop.f32.mrf.mxu0 }
 0x102   :  { %v136_v57 = vadd.f32 %v178_v55, %v159_v53 }
 0x103   :  { %v180_v58 = vpop.f32.mrf.mxu0 }
 0x104   :  { %v141_v59 = vmax.f32 %v136_v57, 0.0 }
 0x106   :  { %142 = vst [vmem:[#allocation7] sm:$0xff] %v141_v59 }
 0x107   :  { %238 = shalt.err (!%p235_p0)
}
 0x108   :  { %152 = dma.vmem_to_hbm [thread:$0]  %s150_s25, 128, %s293_s3, [#allocation4]  }
 0x109   :  { %251 = dma.done.wait [#allocation4], 128  }
 0x10a   :  { %252 = vsyncadd [#allocation4], 4294967168 }
 0x10b   :  { %156 = vsyncpa [#allocation3], 1 }
 0x10c   :  { %157 = vsyncpa [#allocation6], 1 }
 0x10d   :  { %158 = vsyncpa [#allocation4], 1 }

</bundles_post_ra>
